<compile_context>
chip_gen: v5e
topology: v5e:2x2
jax: 0.10.0
libtpu: 0.0.40
codegen_flags: <defaults>
</compile_context>

<pallas_src>
import functools

import jax
import jax.numpy as jnp
from jax.experimental import pallas as pl
from jax.experimental.pallas import tpu as pltpu


def gat_kernel(feat_ref, featv_ref, w_ref, wl_ref, wr_ref, adj_ref, out_ref, *,
               num_heads, out_feats, negative_slope, use_bf16):
    feat = feat_ref[...]            # [N, Din]   all source nodes (resident)
    feat_v = featv_ref[...]         # [TV, Din]  destination-node tile
    w = w_ref[...]                  # [Din, H*F]
    wl = wl_ref[...]                # [Din, H]   attn_l folded into projection
    wr = wr_ref[...]                # [Din, H]   attn_r folded into projection

    # Projection for all source nodes (MXU).  Recomputed per tile so the grid
    # axis carries no scratch state and can be sharded across cores.
    fs = jnp.dot(feat, w, preferred_element_type=jnp.float32)      # [N, H*F]

    # el for all sources / er for this destination tile: one MXU matmul each
    # (replaces per-head XLU reductions).
    el = jnp.dot(feat, wl, preferred_element_type=jnp.float32)     # [N, H]
    er = jnp.dot(feat_v, wr, preferred_element_type=jnp.float32)   # [TV, H]
    el_t = jnp.transpose(el)                                       # [H, N] (one XLU transpose)

    mask = adj_ref[...] > 0.0                                      # [TV, N], adj[v, u]

    head_outs = []
    for h in range(num_heads):                                     # static unroll, H small
        # e[v, u] = leaky_relu(el[u] + er[v]) for edge u -> v
        e = er[:, h:h + 1] + el_t[h:h + 1, :]                      # [TV, N]
        e = jnp.where(e > 0.0, e, negative_slope * e)

        # Edge softmax over incoming edges (axis=1 == source nodes u).
        # Row max over ALL entries is a valid shift (shift invariance); the
        # mask is applied exactly once, on p.
        m = jnp.max(e, axis=1, keepdims=True)                      # [TV, 1]
        p = jnp.where(mask, jnp.exp(e - m), 0.0)                   # [TV, N]
        s = jnp.sum(p, axis=1, keepdims=True)                      # [TV, 1]

        fsh = fs[:, h * out_feats:(h + 1) * out_feats]             # [N, F]
        if use_bf16:
            agg = jnp.dot(p.astype(jnp.bfloat16), fsh.astype(jnp.bfloat16),
                          preferred_element_type=jnp.float32)      # [TV, F]
        else:
            agg = jnp.dot(p, fsh, preferred_element_type=jnp.float32)

        # Normalize after aggregation: TV*F multiplies + EUP reciprocal
        # instead of TV*N divides.  max(s, eps) keeps zero-in-degree rows at 0.
        inv_s = pl.reciprocal(jnp.maximum(s, 1e-9), approx=True)   # [TV, 1]
        head_outs.append(agg * inv_s)

    # Single lane-dense store of the whole tile's [TV, H*F] slab.
    out_ref[...] = jnp.concatenate(head_outs, axis=-1).astype(out_ref.dtype)


def gat_conv(feat, w, attn_l, attn_r, adj, *, num_heads, out_feats,
             negative_slope=0.2, tile_v=8, use_bf16=False):
    """feat: [N, Din]; w: [Din, H*F] (fc.weight^T); attn_*: [H, F];
    adj: [N, N] dense mask, adj[v, u] = 1 iff edge u -> v."""
    n, din = feat.shape
    hf = num_heads * out_feats
    assert n % tile_v == 0, "tile_v must divide N for this demo"

    # Fold attention vectors into the projection weight:
    #   el = sum_f (feat @ W)[., h, f] * attn_l[h, f] = feat @ wl
    w3 = w.reshape(din, num_heads, out_feats)
    wl = jnp.einsum('dhf,hf->dh', w3, attn_l)                      # [Din, H]
    wr = jnp.einsum('dhf,hf->dh', w3, attn_r)                      # [Din, H]

    if use_bf16:
        # bf16 MXU operands (v6e/v7x); accumulation stays f32 in-kernel.
        feat_in = feat.astype(jnp.bfloat16)
        w_in = w.astype(jnp.bfloat16)
        wl_in = wl.astype(jnp.bfloat16)
        wr_in = wr.astype(jnp.bfloat16)
    else:
        feat_in, w_in, wl_in, wr_in = feat, w, wl, wr

    kernel = functools.partial(
        gat_kernel, num_heads=num_heads, out_feats=out_feats,
        negative_slope=negative_slope, use_bf16=use_bf16)

    out = pl.pallas_call(
        kernel,
        out_shape=jax.ShapeDtypeStruct((n, hf), jnp.float32),
        grid_spec=pltpu.PrefetchScalarGridSpec(
            num_scalar_prefetch=0,
            grid=(n // tile_v,),
            in_specs=[
                pl.BlockSpec((n, din), lambda i: (0, 0)),          # feat (all sources, resident)
                pl.BlockSpec((tile_v, din), lambda i: (i, 0)),     # feat (dst tile)
                pl.BlockSpec((din, hf), lambda i: (0, 0)),         # W^T (resident)
                pl.BlockSpec((din, num_heads), lambda i: (0, 0)),  # folded attn_l
                pl.BlockSpec((din, num_heads), lambda i: (0, 0)),  # folded attn_r
                pl.BlockSpec((tile_v, n), lambda i: (i, 0)),       # adj rows for dst tile
            ],
            out_specs=pl.BlockSpec((tile_v, hf), lambda i: (i, 0)),
        ),
        compiler_params=pltpu.CompilerParams(
            dimension_semantics=("parallel",)),
    )(feat_in, feat_in, w_in, wl_in, wr_in, adj)
    return out.reshape(n, num_heads, out_feats)


def gat_ref(feat, w, attn_l, attn_r, adj, *, num_heads, out_feats,
            negative_slope=0.2):
    """Pure-JAX reference of the DGL GATConv forward (dense adjacency)."""
    n = feat.shape[0]
    fs = (feat @ w).reshape(n, num_heads, out_feats)
    el = jnp.sum(fs * attn_l[None], axis=-1)                       # [N, H]
    er = jnp.sum(fs * attn_r[None], axis=-1)                       # [N, H]
    e = el[None, :, :] + er[:, None, :]                            # [Nv, Nu, H]
    e = jnp.where(e > 0.0, e, negative_slope * e)
    mask = adj[:, :, None] > 0.0
    e = jnp.where(mask, e, -jnp.inf)
    a = jax.nn.softmax(e, axis=1)
    a = jnp.where(mask, a, 0.0)
    return jnp.einsum('vuh,uhf->vhf', a, fs)


if __name__ == "__main__":
    # Small shapes: N=16 nodes, in_feats=8, num_heads=4, out_feats=8.
    N, DIN, H, F = 16, 8, 4, 8
    NEG_SLOPE = 0.2

    key = jax.random.PRNGKey(0)
    k1, k2, k3, k4, k5 = jax.random.split(key, 5)

    # Deterministic xavier-normal-style init (gain = sqrt(2), as in reset_parameters).
    gain = 2.0 ** 0.5
    w = jax.random.normal(k1, (DIN, H * F), jnp.float32) * (
        gain * (2.0 / (DIN + H * F)) ** 0.5)                        # fc.weight^T
    attn_l = jax.random.normal(k2, (H, F), jnp.float32) * (
        gain * (2.0 / (H * F + F)) ** 0.5)
    attn_r = jax.random.normal(k3, (H, F), jnp.float32) * (
        gain * (2.0 / (H * F + F)) ** 0.5)

    feat = jax.random.normal(k4, (N, DIN), jnp.float32)

    # Deterministic random graph with self-loops (no zero in-degree nodes).
    adj = (jax.random.uniform(k5, (N, N)) < 0.35).astype(jnp.float32)
    adj = jnp.maximum(adj, jnp.eye(N, dtype=jnp.float32))           # adj[v, u] = edge u->v

    out = gat_conv(feat, w, attn_l, attn_r, adj,
                   num_heads=H, out_feats=F, negative_slope=NEG_SLOPE,
                   tile_v=8, use_bf16=False)
    out = jax.block_until_ready(out)

    ref = gat_ref(feat, w, attn_l, attn_r, adj,
                  num_heads=H, out_feats=F, negative_slope=NEG_SLOPE)
    assert out.shape == (N, H, F)
    # Tolerance accounts for the EUP approx reciprocal and the attn-folding
    # reassociation (both well below this bound in practice).
    assert jnp.allclose(out, ref, rtol=2e-3, atol=2e-3), (
        float(jnp.max(jnp.abs(out - ref))))

    print("KERNEL_OK")
</pallas_src>

<mosaic_0001>
module attributes {stable_mosaic.version = 11 : i64} {
  func.func @gat_kernel(%arg0: i32, %arg1: memref<16x8xf32, #tpu.memory_space<vmem>>, %arg2: memref<8x8xf32, #tpu.memory_space<vmem>>, %arg3: memref<8x32xf32, #tpu.memory_space<vmem>>, %arg4: memref<8x4xf32, #tpu.memory_space<vmem>>, %arg5: memref<8x4xf32, #tpu.memory_space<vmem>>, %arg6: memref<8x16xf32, #tpu.memory_space<vmem>>, %arg7: memref<8x32xf32, #tpu.memory_space<vmem>>) attributes {dimension_semantics = [#tpu.dimension_semantics<parallel>], iteration_bounds = array<i64: 2>, scalar_prefetch = 0 : i64, scratch_operands = 0 : i64, tpu.core_type = #tpu.core_type<tc>, window_params = [{pipeline_mode = #tpu.pipeline_mode<synchronous>, transform_indices = @transform_0, window_bounds = array<i64: 16, 8>}, {transform_indices = @transform_1, window_bounds = array<i64: 8, 8>}, {pipeline_mode = #tpu.pipeline_mode<synchronous>, transform_indices = @transform_2, window_bounds = array<i64: 8, 32>}, {pipeline_mode = #tpu.pipeline_mode<synchronous>, transform_indices = @transform_3, window_bounds = array<i64: 8, 4>}, {pipeline_mode = #tpu.pipeline_mode<synchronous>, transform_indices = @transform_4, window_bounds = array<i64: 8, 4>}, {transform_indices = @transform_5, window_bounds = array<i64: 8, 16>}, {transform_indices = @transform_6, window_bounds = array<i64: 8, 32>}]} {
    %c0 = arith.constant 0 : index
    %c0_0 = arith.constant 0 : index
    %0 = vector.load %arg1[%c0, %c0_0] : memref<16x8xf32, #tpu.memory_space<vmem>>, vector<16x8xf32>
    %c0_1 = arith.constant 0 : index
    %c0_2 = arith.constant 0 : index
    %1 = vector.load %arg2[%c0_1, %c0_2] : memref<8x8xf32, #tpu.memory_space<vmem>>, vector<8x8xf32>
    %c0_3 = arith.constant 0 : index
    %c0_4 = arith.constant 0 : index
    %2 = vector.load %arg3[%c0_3, %c0_4] : memref<8x32xf32, #tpu.memory_space<vmem>>, vector<8x32xf32>
    %c0_5 = arith.constant 0 : index
    %c0_6 = arith.constant 0 : index
    %3 = vector.load %arg4[%c0_5, %c0_6] : memref<8x4xf32, #tpu.memory_space<vmem>>, vector<8x4xf32>
    %c0_7 = arith.constant 0 : index
    %c0_8 = arith.constant 0 : index
    %4 = vector.load %arg5[%c0_7, %c0_8] : memref<8x4xf32, #tpu.memory_space<vmem>>, vector<8x4xf32>
    %cst = arith.constant dense<0.000000e+00> : vector<16x32xf32>
    %5 = tpu.matmul %0, %2, %cst {dimension_numbers = #tpu.dot_dimension_numbers<[1], [0], [0], [1], [0, 0, 1, 1], [], []>} : vector<16x8xf32>, vector<8x32xf32>, vector<16x32xf32> -> vector<16x32xf32>
    %cst_9 = arith.constant dense<0.000000e+00> : vector<16x4xf32>
    %6 = tpu.matmul %0, %3, %cst_9 {dimension_numbers = #tpu.dot_dimension_numbers<[1], [0], [0], [1], [0, 0, 1, 1], [], []>} : vector<16x8xf32>, vector<8x4xf32>, vector<16x4xf32> -> vector<16x4xf32>
    %cst_10 = arith.constant dense<0.000000e+00> : vector<8x4xf32>
    %7 = tpu.matmul %1, %4, %cst_10 {dimension_numbers = #tpu.dot_dimension_numbers<[1], [0], [0], [1], [0, 0, 1, 1], [], []>} : vector<8x8xf32>, vector<8x4xf32>, vector<8x4xf32> -> vector<8x4xf32>
    %8 = tpu.transpose %6, [1, 0] : vector<16x4xf32> -> vector<4x16xf32>
    %c0_11 = arith.constant 0 : index
    %c0_12 = arith.constant 0 : index
    %9 = vector.load %arg6[%c0_11, %c0_12] : memref<8x16xf32, #tpu.memory_space<vmem>>, vector<8x16xf32>
    %cst_13 = arith.constant 0.000000e+00 : f32
    %10 = vector.broadcast %cst_13 : f32 to vector<8x16xf32>
    %11 = arith.cmpf ogt, %9, %10 : vector<8x16xf32>
    %12 = vector.extract_strided_slice %7 {offsets = [0, 0], sizes = [8, 1], strides = [1, 1]} : vector<8x4xf32> to vector<8x1xf32>
    %13 = vector.extract_strided_slice %8 {offsets = [0, 0], sizes = [1, 16], strides = [1, 1]} : vector<4x16xf32> to vector<1x16xf32>
    %14 = vector.broadcast %12 : vector<8x1xf32> to vector<8x16xf32>
    %15 = vector.broadcast %13 : vector<1x16xf32> to vector<8x16xf32>
    %16 = arith.addf %14, %15 : vector<8x16xf32>
    %cst_14 = arith.constant 0.000000e+00 : f32
    %17 = vector.broadcast %cst_14 : f32 to vector<8x16xf32>
    %18 = arith.cmpf ogt, %16, %17 : vector<8x16xf32>
    %cst_15 = arith.constant 2.000000e-01 : f32
    %19 = vector.broadcast %cst_15 : f32 to vector<8x16xf32>
    %20 = arith.mulf %19, %16 : vector<8x16xf32>
    %21 = arith.select %18, %16, %20 : vector<8x16xi1>, vector<8x16xf32>
    %cst_16 = arith.constant dense<0xFF800000> : vector<8xf32>
    %22 = vector.multi_reduction <maximumf>, %21, %cst_16 [1] : vector<8x16xf32> to vector<8xf32>
    %23 = vector.shape_cast %22 : vector<8xf32> to vector<8x1xf32>
    %24 = vector.broadcast %23 : vector<8x1xf32> to vector<8x16xf32>
    %25 = arith.subf %21, %24 : vector<8x16xf32>
    %26 = math.exp %25 : vector<8x16xf32>
    %cst_17 = arith.constant 0.000000e+00 : f32
    %27 = vector.broadcast %cst_17 : f32 to vector<8x16xf32>
    %28 = arith.select %11, %26, %27 : vector<8x16xi1>, vector<8x16xf32>
    %cst_18 = arith.constant dense<0.000000e+00> : vector<8xf32>
    %29 = vector.multi_reduction <add>, %28, %cst_18 [1] : vector<8x16xf32> to vector<8xf32>
    %30 = vector.shape_cast %29 : vector<8xf32> to vector<8x1xf32>
    %31 = vector.extract_strided_slice %5 {offsets = [0, 0], sizes = [16, 8], strides = [1, 1]} : vector<16x32xf32> to vector<16x8xf32>
    %cst_19 = arith.constant dense<0.000000e+00> : vector<8x8xf32>
    %32 = tpu.matmul %28, %31, %cst_19 {dimension_numbers = #tpu.dot_dimension_numbers<[1], [0], [0], [1], [0, 0, 1, 1], [], []>} : vector<8x16xf32>, vector<16x8xf32>, vector<8x8xf32> -> vector<8x8xf32>
    %cst_20 = arith.constant 9.99999971E-10 : f32
    %33 = vector.broadcast %cst_20 : f32 to vector<8x1xf32>
    %34 = arith.maximumf %30, %33 : vector<8x1xf32>
    %35 = tpu.reciprocal %34 {approx = true} : vector<8x1xf32> -> vector<8x1xf32>
    %36 = vector.broadcast %35 : vector<8x1xf32> to vector<8x8xf32>
    %37 = arith.mulf %32, %36 : vector<8x8xf32>
    %38 = vector.extract_strided_slice %7 {offsets = [0, 1], sizes = [8, 1], strides = [1, 1]} : vector<8x4xf32> to vector<8x1xf32>
    %39 = vector.extract_strided_slice %8 {offsets = [1, 0], sizes = [1, 16], strides = [1, 1]} : vector<4x16xf32> to vector<1x16xf32>
    %40 = vector.broadcast %38 : vector<8x1xf32> to vector<8x16xf32>
    %41 = vector.broadcast %39 : vector<1x16xf32> to vector<8x16xf32>
    %42 = arith.addf %40, %41 : vector<8x16xf32>
    %cst_21 = arith.constant 0.000000e+00 : f32
    %43 = vector.broadcast %cst_21 : f32 to vector<8x16xf32>
    %44 = arith.cmpf ogt, %42, %43 : vector<8x16xf32>
    %cst_22 = arith.constant 2.000000e-01 : f32
    %45 = vector.broadcast %cst_22 : f32 to vector<8x16xf32>
    %46 = arith.mulf %45, %42 : vector<8x16xf32>
    %47 = arith.select %44, %42, %46 : vector<8x16xi1>, vector<8x16xf32>
    %cst_23 = arith.constant dense<0xFF800000> : vector<8xf32>
    %48 = vector.multi_reduction <maximumf>, %47, %cst_23 [1] : vector<8x16xf32> to vector<8xf32>
    %49 = vector.shape_cast %48 : vector<8xf32> to vector<8x1xf32>
    %50 = vector.broadcast %49 : vector<8x1xf32> to vector<8x16xf32>
    %51 = arith.subf %47, %50 : vector<8x16xf32>
    %52 = math.exp %51 : vector<8x16xf32>
    %cst_24 = arith.constant 0.000000e+00 : f32
    %53 = vector.broadcast %cst_24 : f32 to vector<8x16xf32>
    %54 = arith.select %11, %52, %53 : vector<8x16xi1>, vector<8x16xf32>
    %cst_25 = arith.constant dense<0.000000e+00> : vector<8xf32>
    %55 = vector.multi_reduction <add>, %54, %cst_25 [1] : vector<8x16xf32> to vector<8xf32>
    %56 = vector.shape_cast %55 : vector<8xf32> to vector<8x1xf32>
    %57 = vector.extract_strided_slice %5 {offsets = [0, 8], sizes = [16, 8], strides = [1, 1]} : vector<16x32xf32> to vector<16x8xf32>
    %cst_26 = arith.constant dense<0.000000e+00> : vector<8x8xf32>
    %58 = tpu.matmul %54, %57, %cst_26 {dimension_numbers = #tpu.dot_dimension_numbers<[1], [0], [0], [1], [0, 0, 1, 1], [], []>} : vector<8x16xf32>, vector<16x8xf32>, vector<8x8xf32> -> vector<8x8xf32>
    %cst_27 = arith.constant 9.99999971E-10 : f32
    %59 = vector.broadcast %cst_27 : f32 to vector<8x1xf32>
    %60 = arith.maximumf %56, %59 : vector<8x1xf32>
    %61 = tpu.reciprocal %60 {approx = true} : vector<8x1xf32> -> vector<8x1xf32>
    %62 = vector.broadcast %61 : vector<8x1xf32> to vector<8x8xf32>
    %63 = arith.mulf %58, %62 : vector<8x8xf32>
    %64 = vector.extract_strided_slice %7 {offsets = [0, 2], sizes = [8, 1], strides = [1, 1]} : vector<8x4xf32> to vector<8x1xf32>
    %65 = vector.extract_strided_slice %8 {offsets = [2, 0], sizes = [1, 16], strides = [1, 1]} : vector<4x16xf32> to vector<1x16xf32>
    %66 = vector.broadcast %64 : vector<8x1xf32> to vector<8x16xf32>
    %67 = vector.broadcast %65 : vector<1x16xf32> to vector<8x16xf32>
    %68 = arith.addf %66, %67 : vector<8x16xf32>
    %cst_28 = arith.constant 0.000000e+00 : f32
    %69 = vector.broadcast %cst_28 : f32 to vector<8x16xf32>
    %70 = arith.cmpf ogt, %68, %69 : vector<8x16xf32>
    %cst_29 = arith.constant 2.000000e-01 : f32
    %71 = vector.broadcast %cst_29 : f32 to vector<8x16xf32>
    %72 = arith.mulf %71, %68 : vector<8x16xf32>
    %73 = arith.select %70, %68, %72 : vector<8x16xi1>, vector<8x16xf32>
    %cst_30 = arith.constant dense<0xFF800000> : vector<8xf32>
    %74 = vector.multi_reduction <maximumf>, %73, %cst_30 [1] : vector<8x16xf32> to vector<8xf32>
    %75 = vector.shape_cast %74 : vector<8xf32> to vector<8x1xf32>
    %76 = vector.broadcast %75 : vector<8x1xf32> to vector<8x16xf32>
    %77 = arith.subf %73, %76 : vector<8x16xf32>
    %78 = math.exp %77 : vector<8x16xf32>
    %cst_31 = arith.constant 0.000000e+00 : f32
    %79 = vector.broadcast %cst_31 : f32 to vector<8x16xf32>
    %80 = arith.select %11, %78, %79 : vector<8x16xi1>, vector<8x16xf32>
    %cst_32 = arith.constant dense<0.000000e+00> : vector<8xf32>
    %81 = vector.multi_reduction <add>, %80, %cst_32 [1] : vector<8x16xf32> to vector<8xf32>
    %82 = vector.shape_cast %81 : vector<8xf32> to vector<8x1xf32>
    %83 = vector.extract_strided_slice %5 {offsets = [0, 16], sizes = [16, 8], strides = [1, 1]} : vector<16x32xf32> to vector<16x8xf32>
    %cst_33 = arith.constant dense<0.000000e+00> : vector<8x8xf32>
    %84 = tpu.matmul %80, %83, %cst_33 {dimension_numbers = #tpu.dot_dimension_numbers<[1], [0], [0], [1], [0, 0, 1, 1], [], []>} : vector<8x16xf32>, vector<16x8xf32>, vector<8x8xf32> -> vector<8x8xf32>
    %cst_34 = arith.constant 9.99999971E-10 : f32
    %85 = vector.broadcast %cst_34 : f32 to vector<8x1xf32>
    %86 = arith.maximumf %82, %85 : vector<8x1xf32>
    %87 = tpu.reciprocal %86 {approx = true} : vector<8x1xf32> -> vector<8x1xf32>
    %88 = vector.broadcast %87 : vector<8x1xf32> to vector<8x8xf32>
    %89 = arith.mulf %84, %88 : vector<8x8xf32>
    %90 = vector.extract_strided_slice %7 {offsets = [0, 3], sizes = [8, 1], strides = [1, 1]} : vector<8x4xf32> to vector<8x1xf32>
    %91 = vector.extract_strided_slice %8 {offsets = [3, 0], sizes = [1, 16], strides = [1, 1]} : vector<4x16xf32> to vector<1x16xf32>
    %92 = vector.broadcast %90 : vector<8x1xf32> to vector<8x16xf32>
    %93 = vector.broadcast %91 : vector<1x16xf32> to vector<8x16xf32>
    %94 = arith.addf %92, %93 : vector<8x16xf32>
    %cst_35 = arith.constant 0.000000e+00 : f32
    %95 = vector.broadcast %cst_35 : f32 to vector<8x16xf32>
    %96 = arith.cmpf ogt, %94, %95 : vector<8x16xf32>
    %cst_36 = arith.constant 2.000000e-01 : f32
    %97 = vector.broadcast %cst_36 : f32 to vector<8x16xf32>
    %98 = arith.mulf %97, %94 : vector<8x16xf32>
    %99 = arith.select %96, %94, %98 : vector<8x16xi1>, vector<8x16xf32>
    %cst_37 = arith.constant dense<0xFF800000> : vector<8xf32>
    %100 = vector.multi_reduction <maximumf>, %99, %cst_37 [1] : vector<8x16xf32> to vector<8xf32>
    %101 = vector.shape_cast %100 : vector<8xf32> to vector<8x1xf32>
    %102 = vector.broadcast %101 : vector<8x1xf32> to vector<8x16xf32>
    %103 = arith.subf %99, %102 : vector<8x16xf32>
    %104 = math.exp %103 : vector<8x16xf32>
    %cst_38 = arith.constant 0.000000e+00 : f32
    %105 = vector.broadcast %cst_38 : f32 to vector<8x16xf32>
    %106 = arith.select %11, %104, %105 : vector<8x16xi1>, vector<8x16xf32>
    %cst_39 = arith.constant dense<0.000000e+00> : vector<8xf32>
    %107 = vector.multi_reduction <add>, %106, %cst_39 [1] : vector<8x16xf32> to vector<8xf32>
    %108 = vector.shape_cast %107 : vector<8xf32> to vector<8x1xf32>
    %109 = vector.extract_strided_slice %5 {offsets = [0, 24], sizes = [16, 8], strides = [1, 1]} : vector<16x32xf32> to vector<16x8xf32>
    %cst_40 = arith.constant dense<0.000000e+00> : vector<8x8xf32>
    %110 = tpu.matmul %106, %109, %cst_40 {dimension_numbers = #tpu.dot_dimension_numbers<[1], [0], [0], [1], [0, 0, 1, 1], [], []>} : vector<8x16xf32>, vector<16x8xf32>, vector<8x8xf32> -> vector<8x8xf32>
    %cst_41 = arith.constant 9.99999971E-10 : f32
    %111 = vector.broadcast %cst_41 : f32 to vector<8x1xf32>
    %112 = arith.maximumf %108, %111 : vector<8x1xf32>
    %113 = tpu.reciprocal %112 {approx = true} : vector<8x1xf32> -> vector<8x1xf32>
    %114 = vector.broadcast %113 : vector<8x1xf32> to vector<8x8xf32>
    %115 = arith.mulf %110, %114 : vector<8x8xf32>
    %116 = tpu.concatenate %37, %63, %89, %115 in 1 : vector<8x8xf32>, vector<8x8xf32>, vector<8x8xf32>, vector<8x8xf32> -> vector<8x32xf32>
    %c0_42 = arith.constant 0 : index
    %c0_43 = arith.constant 0 : index
    %117 = vector.load %arg7[%c0_42, %c0_43] : memref<8x32xf32, #tpu.memory_space<vmem>>, vector<8x32xf32>
    tpu.vector_store %arg7[%c0_42, %c0_43], %116 {strides = array<i32>} : memref<8x32xf32, #tpu.memory_space<vmem>>, vector<8x32xf32>,
    return
  }
  func.func @transform_0(%arg0: i32) -> (i32, i32) {
    %c0_i32 = arith.constant 0 : i32
    %c0_i32_0 = arith.constant 0 : i32
    %c0_i32_1 = arith.constant 0 : i32
    return %c0_i32, %c0_i32_0 : i32, i32
  }
  func.func @transform_1(%arg0: i32) -> (i32, i32) {
    %c0_i32 = arith.constant 0 : i32
    %c0_i32_0 = arith.constant 0 : i32
    return %arg0, %c0_i32 : i32, i32
  }
  func.func @transform_2(%arg0: i32) -> (i32, i32) {
    %c0_i32 = arith.constant 0 : i32
    %c0_i32_0 = arith.constant 0 : i32
    %c0_i32_1 = arith.constant 0 : i32
    return %c0_i32, %c0_i32_0 : i32, i32
  }
  func.func @transform_3(%arg0: i32) -> (i32, i32) {
    %c0_i32 = arith.constant 0 : i32
    %c0_i32_0 = arith.constant 0 : i32
    %c0_i32_1 = arith.constant 0 : i32
    return %c0_i32, %c0_i32_0 : i32, i32
  }
  func.func @transform_4(%arg0: i32) -> (i32, i32) {
    %c0_i32 = arith.constant 0 : i32
    %c0_i32_0 = arith.constant 0 : i32
    %c0_i32_1 = arith.constant 0 : i32
    return %c0_i32, %c0_i32_0 : i32, i32
  }
  func.func @transform_5(%arg0: i32) -> (i32, i32) {
    %c0_i32 = arith.constant 0 : i32
    %c0_i32_0 = arith.constant 0 : i32
    return %arg0, %c0_i32 : i32, i32
  }
  func.func @transform_6(%arg0: i32) -> (i32, i32) {
    %c0_i32 = arith.constant 0 : i32
    %c0_i32_0 = arith.constant 0 : i32
    return %arg0, %c0_i32 : i32, i32
  }
}

</mosaic_0001>

<bundles_post_ra>
// kernel: tpu_custom_call.1
= control target key start
LH: loop header
LB: loop body
LE: loop exit
PB: predicated region body
PF: predicated region fallthrough
CT: control target
= control target key end

     0   :  { %11 = vsyncpa [#allocation3], 0  ;;  %s1035_s0 = inlined_call_operand.vmem [shape: f32[16,8], index: 0, kind: input, shape index: {}]   ;;  %s1036_s1 = inlined_call_operand.vmem [shape: f32[16,8], index: 1, kind: input, shape index: {}]   ;;  %s1037_s2 = inlined_call_operand.vmem [shape: f32[8,32], index: 2, kind: input, shape index: {}]   ;;  %s1038_s3 = inlined_call_operand.vmem [shape: f32[8,4], index: 3, kind: input, shape index: {}]   ;;  %s1039_s4 = inlined_call_operand.vmem [shape: f32[8,4], index: 4, kind: input, shape index: {}]   ;;  %s1040_s5 = inlined_call_operand.vmem [shape: f32[16,16], index: 5, kind: input, shape index: {}]   ;;  %s1041_s6 = inlined_call_operand.hbm [shape: f32[16,32], index: 6, kind: output, shape index: {}]  }
   0x1   :  { %13 = vsyncpa [#allocation3 + $0x1], 0  ;;  %s902_s21 = smov 0   ;;  %s904_s22 = smov 0  }
   0x2   :  { %s906_s23 = smov 0   ;;  %s908_s24 = smov 0  }
   0x3 LB: > { %s923_s25 = sadd.s32 4294967295, %s855_s24   ;;  %s687_s26 = sadd.s32 4294967294, %s855_s24   ;;  %s855_s24 = sphi %s908_s24, %s1047_s24   ;;  %s851_s23 = sphi %s906_s23, %s1046_s23   ;;  %s847_s22 = sphi %s904_s22, %s1045_s22   ;;  %s843_s21 = sphi %s902_s21, %s1044_s21  }
   0x4   : > { %s927_s27 = sadd.s32 1, %s855_s24   ;;  %s162_s28 = sadd.s32 1, %s851_s23 }
   0x5   : > { %s159_s29 = ssub.s32 %s855_s24, %s927_s27  ;;  %p172_p0 = scmp.ne.s32.totalorder %s851_s23, %s847_s22 }
   0x6   : > { %p160_p1 = scmp.eq.s32.totalorder %s159_s29, 0  ;;  %p173_p2 = scmp.eq.s32.totalorder %s923_s25, 1 }
   0x7   : > { %p178_p3 = scmp.ne.s32.totalorder %s847_s22, %s843_s21  ;;  %p179_p4 = scmp.eq.s32.totalorder %s687_s26, 1 }
   0x8   : > { %s938_s30 = scalar_select %p160_p1, %s851_s23, %s162_s28  }
   0x9   : > { %p940_p5 = por %p173_p2, %p172_p0  ;;  %p944_p6 = por %p179_p4, %p178_p3 }
   0xa   : > { %p690_p7 = scmp.ge.s32.totalorder %s855_s24, 1  ;;  %p223_p8 = scmp.lt.s32.totalorder %s855_s24, 3 }
   0xc   : > { %p224_p9 = pnand %p690_p7, %p223_p8 }
   0xd   : > { %p256_p10 = scmp.lt.s32.totalorder (!%p224_p9), %s923_s25, 1  ;;  %s861_s9 = smov (!%p224_p9), 120  }
   0xe   : > { %227 = sbr.rel (%p224_p9) target bundleno = 696 (0x2b8), region = 44  ;;  %s862_s10 = smov (!%p224_p9), 104  }
   0xf   : > { %s863_s11 = smov (!%p224_p9), 112   ;;  %s864_s15 = smov (!%p224_p9), 8  }
  0x10   : > { %s865_s16 = smov (!%p224_p9), 24   ;;  %s704_s20 = sshll.u32 (!%p224_p9), %s923_s25, 3 }
  0x11   : > { %s611_s29 = scalar_lea.hbm (!%p224_p9), %s1041_s6, %s704_s20 }
  0x13   : > { %v268_v0 = vld [vmem:[%s1038_s3] sm:$0xff]  ;;  %vm270_vm0 = vcmask 64512   ;;  %s965_s17 = scalar_select %p256_p10, %s923_s25, 1  ;;  %v265_v5 = vld [vmem:[%s1035_s0 + $0x8] sm:$0xff]  ;;  %v857_v6 = vmov 2   ;;  %v858_v7 = vmov 0  }
  0x14   : > { %v264_v1 = vld [vmem:[%s1035_s0] sm:$0xff]  ;;  %315 = vmatpush.msra.mxu1 %v268_v0  ;;  %759 = vset.pattern.permute.xlu1 %v857_v6  ;;  %v859_v13 = vmov 3   ;;  %v860_v14 = vmov 1   ;;  %vm390_vm1 = vcmask 130048   ;;  %vm596_vm7 = vcmask 195584  }
  0x15   : > { %v269_v2 = vld [vmem:[%s1039_s4] sm:$0xff]  ;;  %696 = vmatmul.msk.f32.vlgmr.msra.gmra.mxu1 %vm270_vm0, %v264_v1  ;;  %s692_s18 = sshll.u32 %s965_s17, 3  ;;  %757 = vset.pattern.permute.xlu0 %v858_v7  ;;  %s866_s17 = smov 16   ;;  %vm598_vm8 = vcmask 261120  }
  0x16   : > { %v267_v3 = vld [vmem:[%s1037_s2] sm:$0xff]  ;;  %341 = vmatpush.msra.mxu2 %v269_v2  ;;  %s259_s26 = scalar_lea.vmem %s1036_s1, %s692_s18  ;;  %s263_s14 = scalar_lea.vmem %s1040_s5, %s692_s18 }
  0x17   : > { %292 = vmatpush.msra.mxu0 %v267_v3  ;;  %v266_v4 = vld [vmem:[%s259_s26] sm:$0xff]  ;;  %s253_s18 = sand.u32 1, %s847_s22  }
  0x18   : > { %694 = vmatmul.msk.f32.vlgmr.msra.gmra.mxu0 %vm270_vm0, %v264_v1  ;;  %698 = vmatmul.msk.f32.vlgmr.msra.gmra.mxu2 %vm270_vm0, %v266_v4  ;;  %v378_v53 = vld [vmem:[%s263_s14] sm:$0xff]  ;;  %s691_s19 = sshll.u32 %s253_s18, 3  ;;  %s601_s25 = scalar_lea.sflag [#allocation3], %s253_s18 }
  0x19   : > { %vm379_vm6 = vcmp.gt.f32.partialorder %v378_v53, 0.0 }
  0x1d   : > { %697 = vmatmul.msk.f32.gmra.mxu1 %vm270_vm0, %v265_v5 }
  0x20   : > { %695 = vmatmul.msk.f32.gmra.mxu0 %vm270_vm0, %v265_v5 }
  0x92   : > { %v317_v8 = vpop.f32.mrf.mxu1 }
  0x93   : > { %346 = vxpose.xlu2.b32.start [1/2] (short) (narrow) %v317_v8, 8 }
  0x95   : > { %v294_v9 = vpop.f32.mrf.mxu0 }
  0x9a   : > { %v320_v10 = vpop.f32.mrf.mxu1 }
  0x9b   : > { %347 = vxpose.xlu2.b32.end [2/2] (short) (narrow) %v320_v10, 8  ;;  %v343_v12 = vpop.f32.mrf.mxu2 }
  0x9c   : > { %481 = vperm.xlu1 %759, %v343_v12   ;;  %382 = vperm.xlu0 %757, %v343_v12  }
  0x9d   : > { %v297_v11 = vpop.f32.mrf.mxu0 }
  0x9e   : > { %418 = vmatpush.msra.mxu3 %v297_v11  ;;  %v761_v15 = vpack.i.bf16 %v294_v9, %v297_v11 }
  0xa0   : > { %419 = vmatpush.msra.mxu3 %v294_v9 }
  0xa4   : > { %760 = vset.pattern.permute.xlu1 %v859_v13  ;;  %758 = vset.pattern.permute.xlu0 %v860_v14 }
  0xa5   : > { %532 = vperm.xlu1 %760, %v343_v12   ;;  %428 = vperm.xlu0 %758, %v343_v12  }
  0xad   : > { %762 = vrot.lane.b32.xlu0 %v761_v15, %s861_s9  ;;  %s255_s9 = scalar_lea.vmem [#allocation2], %s691_s19 }
  0xae   : > { %776 = vset.pattern.permute.xlu0 %v859_v13 }
 0x10e   : > { %v383_v16 = vpop.permute.xlu0 %382  ;;  %v482_v17 = vpop.permute.xlu1 %481 }
 0x117   : > { %v429_v23 = vpop.permute.xlu0 %428  ;;  %v533_v27 = vpop.permute.xlu1 %532 }
 0x11f   : > { %v763_v39 = vpop.permute.xlu0 %762 }
 0x120   : > { %v764_v40 = vunpack.i.l.bf16 %v763_v39  ;;  %v765_v41 = vunpack.i.h.bf16 %v763_v39 }
 0x122   : > { %471 = vmatpush.msrb.mxu2 %v764_v40 }
 0x124   : > { %472 = vmatpush.msrb.mxu2 %v765_v41 }
 0x12c   : > { %v362_v18 = vpop.trf.xlu2 }
 0x12d   : > { %v385_v19 = vperm.slane %v362_v18, 0  ;;  %v484_v20 = vperm.slane %v362_v18, 2  ;;  %v431_v21 = vperm.slane %v362_v18, 1  ;;  %v535_v22 = vperm.slane %v362_v18, 3 }
 0x12f   : > { %v432_v24 = vadd.f32 %v431_v21, %v429_v23  ;;  %v485_v25 = vadd.f32 %v484_v20, %v482_v17  ;;  %v386_v26 = vadd.f32 %v385_v19, %v383_v16  ;;  %v536_v29 = vadd.f32 %v535_v22, %v533_v27 }
 0x131   : > { %v434_v28 = vmul.f32 0.2, %v432_v24  ;;  %vm486_vm2 = vcmp.gt.f32.partialorder %v485_v25, 0.0  ;;  %vm387_vm3 = vcmp.gt.f32.partialorder %v386_v26, 0.0  ;;  %v487_v30 = vmul.f32 0.2, %v485_v25 }
 0x132   : > { %v388_v31 = vmul.f32 0.2, %v386_v26  ;;  %vm433_vm4 = vcmp.gt.f32.partialorder %v432_v24, 0.0  ;;  %v538_v38 = vmul.f32 0.2, %v536_v29  ;;  %vm537_vm5 = vcmp.gt.f32.partialorder %v536_v29, 0.0 }
 0x133   : > { %v435_v32 = vsel %vm433_vm4, %v432_v24, %v434_v28  ;;  %v488_v33 = vsel %vm486_vm2, %v485_v25, %v487_v30 }
 0x134   : > { %v389_v34 = vsel %vm387_vm3, %v386_v26, %v388_v31  ;;  %v436_v35 = vsel %vm390_vm1, %v435_v32, -inf  ;;  %v489_v36 = vsel %vm390_vm1, %v488_v33, -inf  ;;  %v539_v42 = vsel %vm537_vm5, %v536_v29, %v538_v38 }
 0x135   : > { %v391_v37 = vsel %vm390_vm1, %v389_v34, -inf  ;;  %437 = vmax.xlane.f32.xlu2 %v436_v35  ;;  %490 = vmax.xlane.f32.xlu0 %v489_v36  ;;  %v540_v43 = vsel %vm390_vm1, %v539_v42, -inf }
 0x136   : > { %392 = vmax.xlane.f32.xlu1 %v391_v37 }
 0x13e   : > { %541 = vmax.xlane.f32.xlu1 %v540_v43 }
 0x149   : > { %772 = vrot.lane.b32.xlu0 %v761_v15, %s862_s10  ;;  %s613_s10 = sshll.u32 %s255_s9, 4  ;;  %s614_s10 = int_to_ptr.vmem [resolvable:$true] %s613_s10 }
 0x157   : > { %767 = vrot.lane.b32.xlu1 %v761_v15, %s863_s11  ;;  %s615_s11 = sshll.u32 %s611_s29, 4  ;;  %s616_s11 = int_to_ptr.hbm [resolvable:$true] %s615_s11 }
 0x158   : > { %s807_s12 = sshra.s32 %s616_s11, 4  ;;  %s808_s12 = int_to_ptr.hbm [resolvable:$true] %s807_s12 }
 0x159   : > { %s809_s13 = scalar_lea.hbm %s808_s12, 8  ;;  %p814_p0 = scmp.lt.s32.totalorder %s808_s12, %s1041_s6 }
 0x15a   : > { %p810_p11 = scmp.ne.s32.totalorder %s808_s12, %s809_s13 }
 0x15c   : > { %p811_p12 = pnand %p810_p11, %p940_p5 }
 0x15e   : > { %p812_p13 = pneg %p811_p12 }
 0x1a8   : > { %v438_v44 = vpop.xlane.xlu2 %437  ;;  %v491_v47 = vpop.xlane.xlu0 %490 }
 0x1a9   : > { %v393_v45 = vpop.xlane.xlu1 %392  ;;  %v439_v46 = vsub.f32 %v435_v32, %v438_v44  ;;  %v492_v49 = vsub.f32 %v488_v33, %v491_v47 }
 0x1aa   : > { %v394_v48 = vsub.f32 %v389_v34, %v393_v45 }
 0x1ab   : > { %v440_v50 = vmul.f32 1.442695, %v439_v46  ;;  %v493_v52 = vmul.f32 1.442695, %v492_v49 }
 0x1ac   : > { %v395_v51 = vmul.f32 1.442695, %v394_v48 }
 0x1ad   : > { %777 = vpow2.f32 %v440_v50 }
 0x1ae   : > { %779 = vpow2.f32 %v395_v51 }
 0x1af   : > { %781 = vpow2.f32 %v493_v52 }
 0x1b1   : > { %v542_v54 = vpop.xlane.xlu1 %541 }
 0x1b2   : > { %v543_v55 = vsub.f32 %v539_v42, %v542_v54 }
 0x1b3   : > { %v778_v56 = vpop.eup %777 }
 0x1b4   : > { %v780_v57 = vpop.eup %779  ;;  %v544_v58 = vmul.f32 1.442695, %v543_v55  ;;  %v442_v59 = vsel %vm379_vm6, %v778_v56, 0.0 }
 0x1b5   : > { %v782_v60 = vpop.eup %781  ;;  %v397_v61 = vsel %vm379_vm6, %v780_v57, 0.0  ;;  %700 = vmatmul.msk.f32.vlgmr.msrb.gmra.mxu2 %vm390_vm1, %v442_v59  ;;  %v443_v62 = vsel %vm390_vm1, %v442_v59, 0.0 }
 0x1b6   : > { %783 = vpow2.f32 %v544_v58  ;;  %699 = vmatmul.msk.f32.vlgmr.msra.gmra.mxu3 %vm390_vm1, %v397_v61  ;;  %444 = vadd.xlane.f32.xlu1 %v443_v62  ;;  %v495_v63 = vsel %vm379_vm6, %v782_v60, 0.0  ;;  %v398_v4 = vsel %vm390_vm1, %v397_v61, 0.0 }
 0x1b7   : > { %v496_v0 = vsel %vm390_vm1, %v495_v63, 0.0 }
 0x1b8   : > { %497 = vadd.xlane.f32.xlu0 %v496_v0 }
 0x1bb   : > { %v773_v2 = vpop.permute.xlu0 %772 }
 0x1bc   : > { %v784_v1 = vpop.eup %783  ;;  %v774_v5 = vunpack.i.l.bf16 %v773_v2  ;;  %v775_v7 = vunpack.i.h.bf16 %v773_v2 }
 0x1bd   : > { %v546_v3 = vsel %vm379_vm6, %v784_v1, 0.0 }
 0x1be   : > { %v547_v6 = vsel %vm390_vm1, %v546_v3, 0.0  ;;  %399 = vadd.xlane.f32.xlu1 %v398_v4  ;;  %573 = vmatpush.msrb.mxu0 %v774_v5 }
 0x1bf   : > { %548 = vadd.xlane.f32.xlu2 %v547_v6 }
 0x1c0   : > { %574 = vmatpush.msrb.mxu0 %v775_v7 }
 0x1c1   : > { %702 = vmatmul.msk.f32.vlgmr.msrb.gmra.mxu0 %vm390_vm1, %v546_v3 }
 0x1c9   : > { %v768_v8 = vpop.permute.xlu1 %767 }
 0x1ca   : > { %v769_v9 = vunpack.i.l.bf16 %v768_v8  ;;  %v770_v10 = vunpack.i.h.bf16 %v768_v8 }
 0x1cc   : > { %522 = vmatpush.msrb.mxu3 %v769_v9 }
 0x1ce   : > { %523 = vmatpush.msrb.mxu3 %v770_v10 }
 0x1cf   : > { %701 = vmatmul.msk.f32.vlgmr.msrb.gmra.mxu3 %vm390_vm1, %v495_v63 }
 0x229   : > { %v445_v11 = vpop.xlane.xlu1 %444 }
 0x22a   : > { %v477_v12 = vmax.f32 %v445_v11, 1e-09 }
 0x22b   : > { %v498_v21 = vpop.xlane.xlu0 %497 }
 0x22c   : > { %785 = vrcp.f32 %v477_v12  ;;  %v528_v22 = vmax.f32 %v498_v21, 1e-09 }
 0x231   : > { %v400_v27 = vpop.xlane.xlu1 %399 }
 0x232   : > { %v549_v13 = vpop.xlane.xlu2 %548  ;;  %v786_v15 = vpop.eup %785  ;;  %v424_v28 = vmax.f32 %v400_v27, 1e-09 }
 0x233   : > { %v579_v14 = vmax.f32 %v549_v13, 1e-09 }
 0x235   : > { %787 = vrcp.f32 %v579_v14 }
 0x236   : > { %789 = vrcp.f32 %v528_v22 }
 0x237   : > { %791 = vrcp.f32 %v424_v28 }
 0x238   : > { %v474_v16 = vpop.f32.mrf.mxu2 }
 0x239   : > { %v479_v17 = vmul.f32 %v786_v15, %v474_v16  ;;  %v421_v23 = vpop.f32.mrf.mxu3 }
 0x23b   : > { %583 = vrot.lane.b32.xlu0 %v479_v17, %s864_s15  ;;  %v788_v18 = vpop.eup %787 }
 0x23c   : > { %v790_v24 = vpop.eup %789 }
 0x23d   : > { %v792_v29 = vpop.eup %791 }
 0x23e   : > { %v576_v19 = vpop.f32.mrf.mxu0  ;;  %v426_v31 = vmul.f32 %v792_v29, %v421_v23 }
 0x23f   : > { %v581_v20 = vmul.f32 %v788_v18, %v576_v19 }
 0x241   : > { %591 = vrot.lane.b32.xlu1 %v581_v20, %s865_s16  ;;  %s813_s16 = scalar_lea.hbm %s1041_s6, 16 }
 0x242   : > { %p815_p1 = scmp.lt.s32.totalorder %s813_s16, %s809_s13 }
 0x244   : > { %p816_p2 = por %p815_p1, %p814_p0 }
 0x246   : > { %p817_p3 = pnand %p816_p2, %p812_p13 }
 0x252   : > { %v525_v25 = vpop.f32.mrf.mxu3 }
 0x253   : > { %v530_v26 = vmul.f32 %v790_v24, %v525_v25 }
 0x255   : > { %587 = vrot.lane.b32.xlu2 %v530_v26, %s866_s17 }
 0x2ad   : > { %v584_v30 = vpop.permute.xlu0 %583 }
 0x2ae   : > { %v594_v32 = vsel %vm270_vm0, %v426_v31, %v584_v30 }
 0x2af   : > { %v588_v33 = vpop.permute.xlu2 %587 }
 0x2b0   : > { %v595_v34 = vsel %vm390_vm1, %v594_v32, %v588_v33 }
 0x2b3   : > { %v592_v35 = vpop.permute.xlu1 %591 }
 0x2b4   : > { %v597_v36 = vsel %vm596_vm7, %v595_v34, %v592_v35 }
 0x2b5   : > { %599 = vst.msk [vmem:[%s255_s9] sm:$0xff] %vm598_vm8, %v597_v36 }
 0x2b6   : > { %820 = shalt.err (!%p817_p3)
}
 0x2b7   : > { %707 = dma.vmem_to_hbm [thread:$0]  (%p940_p5), %s614_s10, 128, %s616_s11, %s601_s25  }
 0x2b8 PF: > { %p713_p4 = scmp.ge.s32.totalorder %s855_s24, 2  ;;  %s627_s18 = sand.u32 1, %s843_s21  }
 0x2b9   : > { %s628_s20 = scalar_lea.sflag [#allocation3], %s627_s18 }
 0x2ba   : > { %p710_p7 = pnand %p713_p4, %p944_p6 }
 0x2bc   : > { %p711_p8 = pneg %p710_p7 }
 0x2be   : > { %838 = dma.done.wait (%p711_p8), %s628_s20, 128  }
 0x2bf   : > { %840 = vsyncadd (%p711_p8), %s628_s20, 4294967168  ;;  %p16_p9 = scmp.ge.s32.totalorder %s927_s27, 4   ;;  %s1044_s21 = smov %s847_s22 }
 0x2c0   : > { %s1045_s22 = smov %s851_s23  ;;  %s1046_s23 = smov %s938_s30 }
 0x2c1   : > { %s1047_s24 = smov %s927_s27  ;;  %18 = sbr.rel (!%p16_p9) target bundleno = 3 (0x3), region = 82 }
 0x2c6   :  { %634 = vsyncpa [#allocation3], 1 }
 0x2c7   :  { %636 = vsyncpa [#allocation3 + $0x1], 1 }

</bundles_post_ra>
